<compile_context>
chip_gen: v7x
topology: tpu7x:2x2x1
jax: 0.10.0
libtpu: 0.0.40
codegen_flags: <defaults>
</compile_context>

<pallas_src>
import functools
import math

import jax
import jax.numpy as jnp
from jax.experimental import pallas as pl
from jax.experimental.pallas import tpu as pltpu


def _pick_tile(dim, preferred):
    """Largest preferred tile that divides `dim`, else the full dim."""
    divisors = [t for t in preferred if t <= dim and dim % t == 0]
    return max(divisors) if divisors else dim


# ----------------------------------------------------------------------------
# Fused dense kernel: y = epilogue(x @ W + b)
#   epilogue = [exact GELU] -> [+ residual] -> [LayerNorm * gamma + beta]
# Tiled matmul with K as the innermost (reduction) grid axis and a persistent
# f32 VMEM accumulator; the epilogue runs on the resident accumulator at the
# final K step (no extra HBM round trip). Storage dtype is bf16; all epilogue
# math is f32.
# ----------------------------------------------------------------------------
def _fused_dense_kernel(x_ref, w_ref, b_ref, *rest,
                        activation, has_residual, has_ln, eps):
    o_ref, acc_ref = rest[-2], rest[-1]
    extras = rest[:-2]
    pos = 0
    res_ref = None
    g_ref = beta_ref = None
    if has_residual:
        res_ref = extras[pos]
        pos += 1
    if has_ln:
        g_ref, beta_ref = extras[pos], extras[pos + 1]

    @pl.when(pl.program_id(2) == 0)
    def _():
        acc_ref[...] = jnp.zeros_like(acc_ref)

    # MXU matmul in bf16 storage dtype, f32 accumulation (no pre-matmul up-casts).
    acc_ref[...] += jnp.dot(x_ref[...], w_ref[...],
                            preferred_element_type=jnp.float32)

    @pl.when(pl.program_id(2) == pl.num_programs(2) - 1)
    def _():
        y = acc_ref[...] + b_ref[...].astype(jnp.float32)
        if activation == "gelu":  # exact (erf) GELU, as in BERT; f32 math
            y = 0.5 * y * (1.0 + jax.lax.erf(y * (1.0 / math.sqrt(2.0))))
        if has_residual:
            y = y + res_ref[...].astype(jnp.float32)
        if has_ln:
            # Stage the pre-norm value through the resident accumulator to bound
            # live f32 ranges during the LN finalize (per review).
            acc_ref[...] = y
            y = acc_ref[...]
            mu = jnp.mean(y, axis=-1, keepdims=True)
            yc = y - mu
            var = jnp.mean(yc * yc, axis=-1, keepdims=True)
            y = yc * jax.lax.rsqrt(var + eps)
            y = (y * g_ref[...].astype(jnp.float32)
                 + beta_ref[...].astype(jnp.float32))
        o_ref[...] = y.astype(o_ref.dtype)


def fused_dense(x, w, b, *, activation=None, residual=None,
                ln_gamma=None, ln_beta=None, eps=1e-12):
    M, K = x.shape
    K2, N = w.shape
    assert K == K2
    has_residual = residual is not None
    has_ln = ln_gamma is not None

    TM = _pick_tile(M, (512, 256, 128))
    TK = _pick_tile(K, (1024, 512, 256, 128))
    # LayerNorm epilogue needs the full hidden row resident -> TN = N.
    TN = N if has_ln else _pick_tile(N, (512, 256, 128))
    # v7x has two TensorCores: when LN collapses the N grid to 1, keep >= 2
    # parallel blocks along M if a smaller dividing tile allows it.
    if has_ln and M // TM < 2:
        for t in (256, 128):
            if t < TM and M % t == 0:
                TM = t
                break
    grid = (M // TM, N // TN, K // TK)   # M/N parallel, K (reduction) last

    in_specs = [
        pl.BlockSpec((TM, TK), lambda i, j, k: (i, k)),
        pl.BlockSpec((TK, TN), lambda i, j, k: (k, j)),
        pl.BlockSpec((1, TN), lambda i, j, k: (0, j)),   # stays resident across k
    ]
    operands = [x, w, b]
    if has_residual:
        in_specs.append(pl.BlockSpec((TM, TN), lambda i, j, k: (i, j)))
        operands.append(residual)
    if has_ln:
        in_specs.append(pl.BlockSpec((1, TN), lambda i, j, k: (0, j)))
        in_specs.append(pl.BlockSpec((1, TN), lambda i, j, k: (0, j)))
        operands.extend([ln_gamma, ln_beta])

    # Explicit VMEM budget (double-buffered blocks + f32 accumulator), so larger
    # tiles don't trip the default scoped limits (16/32 MiB) and we stay within
    # v7x's 64 MiB physical VMEM.
    in_b = jnp.dtype(x.dtype).itemsize
    est = (2 * TM * TK * in_b + 2 * TK * TN * in_b + 2 * TN * in_b
           + 2 * TM * TN * in_b + TM * TN * 4)
    if has_residual:
        est += 2 * TM * TN * in_b
    if has_ln:
        est += 4 * TN * in_b
    vmem_limit = min(max(int(est * 1.5) + (2 << 20), 32 << 20), 64 << 20)

    kernel = functools.partial(_fused_dense_kernel, activation=activation,
                               has_residual=has_residual, has_ln=has_ln, eps=eps)
    return pl.pallas_call(
        kernel,
        out_shape=jax.ShapeDtypeStruct((M, N), x.dtype),
        grid=grid,
        in_specs=in_specs,
        out_specs=pl.BlockSpec((TM, TN), lambda i, j, k: (i, j)),
        scratch_shapes=[pltpu.VMEM((TM, TN), jnp.float32)],
        compiler_params=pltpu.CompilerParams(
            dimension_semantics=("parallel", "parallel", "arbitrary"),
            vmem_limit_bytes=vmem_limit),
    )(*operands)


# ----------------------------------------------------------------------------
# Standalone LayerNorm (no residual) for the embedding output. f32 math.
# ----------------------------------------------------------------------------
def _ln_kernel(x_ref, g_ref, b_ref, o_ref, *, eps):
    x = x_ref[...].astype(jnp.float32)
    mu = jnp.mean(x, axis=-1, keepdims=True)
    xc = x - mu
    var = jnp.mean(xc * xc, axis=-1, keepdims=True)
    y = xc * jax.lax.rsqrt(var + eps)
    y = y * g_ref[...].astype(jnp.float32) + b_ref[...].astype(jnp.float32)
    o_ref[...] = y.astype(o_ref.dtype)


def layernorm(x, gamma, beta, eps=1e-12):
    M, H = x.shape
    TM = _pick_tile(M, (512, 256, 128))
    return pl.pallas_call(
        functools.partial(_ln_kernel, eps=eps),
        out_shape=jax.ShapeDtypeStruct((M, H), x.dtype),
        grid=(M // TM,),
        in_specs=[
            pl.BlockSpec((TM, H), lambda i: (i, 0)),
            pl.BlockSpec((1, H), lambda i: (0, 0)),
            pl.BlockSpec((1, H), lambda i: (0, 0)),
        ],
        out_specs=pl.BlockSpec((TM, H), lambda i: (i, 0)),
        compiler_params=pltpu.CompilerParams(dimension_semantics=("parallel",)),
    )(x, gamma, beta)


# ----------------------------------------------------------------------------
# Flash-style self-attention over a fused (B, S, 3H) [K|V|Q] tensor.
# grid = (B, S/TQ, S/TKV); KV is the reduction axis with online softmax.
#  * K+V arrive in a single (TKV, 2H) DMA; Q columns are pre-scaled by 1/sqrt(Dh).
#  * The additive mask is a resident (1,1,1,S) block, windowed with pl.ds.
#  * QK^T and PV are head-batched einsums over (nH, *, Dh) views; the softmax
#    state (m, l, acc) is updated whole-array (no per-head indexing).
#  * Finalize divides by l via pl.reciprocal (EUP) and emits one lane-dense
#    (TQ, H) store.
# ----------------------------------------------------------------------------
def _flash_attn_kernel(q_ref, kv_ref, mask_ref, o_ref,
                       m_ref, l_ref, acc_ref, *, num_heads, head_dim, tkv):
    ki = pl.program_id(2)
    H = num_heads * head_dim

    @pl.when(ki == 0)
    def _():
        m_ref[...] = jnp.full_like(m_ref, -jnp.inf)
        l_ref[...] = jnp.zeros_like(l_ref)
        acc_ref[...] = jnp.zeros_like(acc_ref)

    # Additive mask window for this kv tile: (1, TKV), f32.
    start = pl.multiple_of(ki * tkv, tkv)
    mask = mask_ref[0, 0, :, pl.ds(start, tkv)].astype(jnp.float32)

    q_all = q_ref[0]                                  # (TQ,  H) — already scaled
    kv_all = kv_ref[0]                                # (TKV, 2H) = [K | V]

    # Head-batched views (static lane slices -> stacked along a leading batch dim).
    q3 = jnp.stack([q_all[:, h * head_dim:(h + 1) * head_dim]
                    for h in range(num_heads)], axis=0)              # (nH, TQ, Dh)
    k3 = jnp.stack([kv_all[:, h * head_dim:(h + 1) * head_dim]
                    for h in range(num_heads)], axis=0)              # (nH, TKV, Dh)
    v3 = jnp.stack([kv_all[:, H + h * head_dim:H + (h + 1) * head_dim]
                    for h in range(num_heads)], axis=0)              # (nH, TKV, Dh)

    s = jnp.einsum('hqd,hkd->hqk', q3, k3,
                   preferred_element_type=jnp.float32)               # (nH, TQ, TKV)
    s = s + mask                                                     # broadcast over heads/rows

    m_prev = m_ref[...]                                              # (nH, TQ, 1)
    m_new = jnp.maximum(m_prev, jnp.max(s, axis=-1, keepdims=True))
    alpha = jnp.exp(m_prev - m_new)
    p = jnp.exp(s - m_new)
    l_ref[...] = alpha * l_ref[...] + jnp.sum(p, axis=-1, keepdims=True)
    acc_ref[...] = alpha * acc_ref[...] + jnp.einsum(
        'hqk,hkd->hqd', p.astype(v3.dtype), v3,
        preferred_element_type=jnp.float32)                          # (nH, TQ, Dh)
    m_ref[...] = m_new

    @pl.when(ki == pl.num_programs(2) - 1)
    def _():
        inv_l = pl.reciprocal(l_ref[...], approx=True)               # EUP vrcp
        out3 = acc_ref[...] * inv_l                                  # (nH, TQ, Dh)
        # One lane-dense (TQ, H) store (heads concatenated along lanes).
        o_ref[0] = jnp.concatenate([out3[h] for h in range(num_heads)],
                                   axis=-1).astype(o_ref.dtype)


def flash_attention(kvq, add_mask, *, num_heads):
    # kvq: (B, S, 3H) fused [K|V|Q] projections; add_mask: (B,1,1,S) additive f32.
    B, S, threeH = kvq.shape
    H = threeH // 3
    Dh = H // num_heads
    TQ = _pick_tile(S, (256, 128))
    TKV = _pick_tile(S, (512, 256, 128))
    grid = (B, S // TQ, S // TKV)

    itemsize = jnp.dtype(kvq.dtype).itemsize
    est = (2 * TQ * H * itemsize + 2 * TKV * 2 * H * itemsize
           + 2 * S * 4 + 2 * TQ * H * itemsize
           + num_heads * TQ * (2 + Dh) * 4)
    vmem_limit = min(max(int(est * 1.5) + (2 << 20), 32 << 20), 64 << 20)

    kernel = functools.partial(_flash_attn_kernel,
                               num_heads=num_heads, head_dim=Dh, tkv=TKV)
    return pl.pallas_call(
        kernel,
        out_shape=jax.ShapeDtypeStruct((B, S, H), kvq.dtype),
        grid=grid,
        in_specs=[
            # Q column group ([2H, 3H)) — one (TQ, H) block per query tile.
            pl.BlockSpec((1, TQ, H), lambda b, qi, ki: (b, qi, 2)),
            # K+V column group ([0, 2H)) — one contiguous (TKV, 2H) DMA per kv step.
            pl.BlockSpec((1, TKV, 2 * H), lambda b, qi, ki: (b, ki, 0)),
            # Full mask row, resident across qi/ki (windowed in-kernel with pl.ds).
            pl.BlockSpec((1, 1, 1, S), lambda b, qi, ki: (b, 0, 0, 0)),
        ],
        out_specs=pl.BlockSpec((1, TQ, H), lambda b, qi, ki: (b, qi, 0)),
        scratch_shapes=[
            pltpu.VMEM((num_heads, TQ, 1), jnp.float32),    # running max
            pltpu.VMEM((num_heads, TQ, 1), jnp.float32),    # running denom
            pltpu.VMEM((num_heads, TQ, Dh), jnp.float32),   # running numerator
        ],
        compiler_params=pltpu.CompilerParams(
            dimension_semantics=("parallel", "parallel", "arbitrary"),
            vmem_limit_bytes=vmem_limit),
    )(kvq, kvq, add_mask)


# ----------------------------------------------------------------------------
# Deterministic tiny-BERT parameters (bf16 storage; QKV weights pre-fused as
# [K | V | Q*1/sqrt(Dh)] so the forward pass does no per-layer concat).
# ----------------------------------------------------------------------------
def init_params(key, *, vocab=100, type_vocab=2, max_pos=32,
                H=128, nH=4, inter=512, L=2, dtype=jnp.bfloat16):
    keys = iter(jax.random.split(key, 8 + L * 16))
    scale = 1.0 / math.sqrt(H // nH)

    def w(shape, s=0.02):
        return s * jax.random.normal(next(keys), shape, dtype=jnp.float32)

    def zeros(shape):
        return jnp.zeros(shape, jnp.float32)

    def ones(shape):
        return jnp.ones(shape, jnp.float32)

    def cast(x):
        return x.astype(dtype)

    params = {
        "word_emb": cast(w((vocab, H))),
        "pos_emb": cast(w((max_pos, H))),
        "type_emb": cast(w((type_vocab, H))),
        "emb_ln_g": cast(ones((1, H))),
        "emb_ln_b": cast(zeros((1, H))),
        "layers": [],
    }
    for _ in range(L):
        wq, wk, wv = w((H, H)), w((H, H)), w((H, H))
        bq, bk, bv = zeros((1, H)), zeros((1, H)), zeros((1, H))
        params["layers"].append({
            # fused [K | V | Q*scale] projection, hoisted out of the forward pass
            "wqkv": cast(jnp.concatenate([wk, wv, wq * scale], axis=1)),
            "bqkv": cast(jnp.concatenate([bk, bv, bq * scale], axis=1)),
            "wo": cast(w((H, H))), "bo": cast(zeros((1, H))),
            "ln1_g": cast(ones((1, H))), "ln1_b": cast(zeros((1, H))),
            "wi": cast(w((H, inter))), "bi": cast(zeros((1, inter))),
            "wo2": cast(w((inter, H))), "bo2": cast(zeros((1, H))),
            "ln2_g": cast(ones((1, H))), "ln2_b": cast(zeros((1, H))),
        })
    return params


# ----------------------------------------------------------------------------
# SupModel forward (BERT encoder, pooling='cls')
# ----------------------------------------------------------------------------
def sup_model_forward(params, input_ids, attention_mask, token_type_ids,
                      *, num_heads=4, pooling="cls"):
    B, S = input_ids.shape
    H = params["word_emb"].shape[1]

    # --- embeddings (gathers are XLA glue; LN runs in a Pallas kernel) ---
    pos_ids = jnp.arange(S, dtype=jnp.int32)
    emb = (jnp.take(params["word_emb"], input_ids, axis=0)
           + jnp.take(params["pos_emb"], pos_ids, axis=0)[None, :, :]
           + jnp.take(params["type_emb"], token_type_ids, axis=0))
    h = layernorm(emb.reshape(B * S, H),
                  params["emb_ln_g"], params["emb_ln_b"])

    # additive attention mask, (B, 1, 1, S): 0 keep / -1e4 pad (kept in f32)
    add_mask = ((1.0 - attention_mask.astype(jnp.float32)) * -10000.0)
    add_mask = add_mask[:, None, None, :]

    hidden_states = [h]
    for lp in params["layers"]:
        # --- self-attention: fused [K|V|Q] projection (scale folded at init) ---
        kvq = fused_dense(h, lp["wqkv"], lp["bqkv"])              # (B*S, 3H)
        ctx = flash_attention(kvq.reshape(B, S, 3 * H), add_mask,
                              num_heads=num_heads)                # (B, S, H)
        # attention output projection + residual + LayerNorm (single kernel)
        h = fused_dense(ctx.reshape(B * S, H), lp["wo"], lp["bo"],
                        residual=h, ln_gamma=lp["ln1_g"], ln_beta=lp["ln1_b"])

        # --- feed-forward: GELU fused into the first dense, LN into the second ---
        inter = fused_dense(h, lp["wi"], lp["bi"], activation="gelu")
        h = fused_dense(inter, lp["wo2"], lp["bo2"],
                        residual=h, ln_gamma=lp["ln2_g"], ln_beta=lp["ln2_b"])
        hidden_states.append(h)

    last_hidden = h.reshape(B, S, H)

    if pooling == "cls":
        return last_hidden[:, 0]                        # (B, H)
    if pooling == "last-avg":
        return jnp.mean(last_hidden, axis=1)            # (B, H)
    if pooling == "first-last-avg":
        first = hidden_states[1].reshape(B, S, H)
        return 0.5 * (jnp.mean(first, axis=1) + jnp.mean(last_hidden, axis=1))
    # TODO(synk): 'pooler' path needs BERT's pretrained tanh pooler head
    # (dense+tanh on the CLS token); omitted since the default forward uses 'cls'.
    raise ValueError(f"unsupported pooling: {pooling}")


# ----------------------------------------------------------------------------
if __name__ == "__main__":
    B, S = 2, 8
    H, nH, inter, L = 128, 4, 512, 2     # lane-aligned small config
    vocab, type_vocab = 100, 2

    key = jax.random.PRNGKey(0)
    kp, ki_, km, kt = jax.random.split(key, 4)

    params = init_params(kp, vocab=vocab, type_vocab=type_vocab, max_pos=32,
                         H=H, nH=nH, inter=inter, L=L, dtype=jnp.bfloat16)

    input_ids = jax.random.randint(ki_, (B, S), 0, vocab, dtype=jnp.int32)
    # first 6 tokens valid, last 2 padded (exercises the additive mask)
    attention_mask = (jnp.arange(S)[None, :] < 6).astype(jnp.int32).repeat(B, axis=0)
    token_type_ids = jnp.zeros((B, S), dtype=jnp.int32)

    out = sup_model_forward(params, input_ids, attention_mask, token_type_ids,
                            num_heads=nH, pooling="cls")
    out = jax.block_until_ready(out)
    assert out.shape == (B, H)
    assert bool(jnp.all(jnp.isfinite(out.astype(jnp.float32))))
    print("KERNEL_OK")
</pallas_src>

<mosaic_0001>
module attributes {stable_mosaic.version = 11 : i64} {
  func.func @_ln_kernel(%arg0: i32, %arg1: memref<16x128xbf16, #tpu.memory_space<vmem>>, %arg2: memref<1x128xbf16, #tpu.memory_space<vmem>>, %arg3: memref<1x128xbf16, #tpu.memory_space<vmem>>, %arg4: memref<16x128xbf16, #tpu.memory_space<vmem>>) attributes {dimension_semantics = [#tpu.dimension_semantics<parallel>], iteration_bounds = array<i64: 1>, scalar_prefetch = 0 : i64, scratch_operands = 0 : i64, tpu.core_type = #tpu.core_type<tc>, window_params = [{transform_indices = @transform_0, window_bounds = array<i64: 16, 128>}, {pipeline_mode = #tpu.pipeline_mode<synchronous>, transform_indices = @transform_1, window_bounds = array<i64: 1, 128>}, {pipeline_mode = #tpu.pipeline_mode<synchronous>, transform_indices = @transform_2, window_bounds = array<i64: 1, 128>}, {transform_indices = @transform_3, window_bounds = array<i64: 16, 128>}]} {
    %c0 = arith.constant 0 : index
    %c0_0 = arith.constant 0 : index
    %0 = vector.load %arg1[%c0, %c0_0] : memref<16x128xbf16, #tpu.memory_space<vmem>>, vector<16x128xbf16>
    %1 = arith.extf %0 : vector<16x128xbf16> to vector<16x128xf32>
    %cst = arith.constant dense<0.000000e+00> : vector<16xf32>
    %2 = vector.multi_reduction <add>, %1, %cst [1] : vector<16x128xf32> to vector<16xf32>
    %3 = vector.shape_cast %2 : vector<16xf32> to vector<16x1xf32>
    %cst_1 = arith.constant 1.280000e+02 : f32
    %4 = vector.broadcast %cst_1 : f32 to vector<16x1xf32>
    %5 = arith.divf %3, %4 : vector<16x1xf32>
    %6 = vector.broadcast %5 : vector<16x1xf32> to vector<16x128xf32>
    %7 = arith.subf %1, %6 : vector<16x128xf32>
    %8 = arith.mulf %7, %7 : vector<16x128xf32>
    %cst_2 = arith.constant dense<0.000000e+00> : vector<16xf32>
    %9 = vector.multi_reduction <add>, %8, %cst_2 [1] : vector<16x128xf32> to vector<16xf32>
    %10 = vector.shape_cast %9 : vector<16xf32> to vector<16x1xf32>
    %cst_3 = arith.constant 1.280000e+02 : f32
    %11 = vector.broadcast %cst_3 : f32 to vector<16x1xf32>
    %12 = arith.divf %10, %11 : vector<16x1xf32>
    %cst_4 = arith.constant 9.99999996E-13 : f32
    %13 = vector.broadcast %cst_4 : f32 to vector<16x1xf32>
    %14 = arith.addf %12, %13 : vector<16x1xf32>
    %15 = math.rsqrt %14 : vector<16x1xf32>
    %16 = vector.broadcast %15 : vector<16x1xf32> to vector<16x128xf32>
    %17 = arith.mulf %7, %16 : vector<16x128xf32>
    %c0_5 = arith.constant 0 : index
    %c0_6 = arith.constant 0 : index
    %18 = vector.load %arg2[%c0_5, %c0_6] : memref<1x128xbf16, #tpu.memory_space<vmem>>, vector<1x128xbf16>
    %19 = arith.extf %18 : vector<1x128xbf16> to vector<1x128xf32>
    %20 = vector.broadcast %19 : vector<1x128xf32> to vector<16x128xf32>
    %21 = arith.mulf %17, %20 : vector<16x128xf32>
    %c0_7 = arith.constant 0 : index
    %c0_8 = arith.constant 0 : index
    %22 = vector.load %arg3[%c0_7, %c0_8] : memref<1x128xbf16, #tpu.memory_space<vmem>>, vector<1x128xbf16>
    %23 = arith.extf %22 : vector<1x128xbf16> to vector<1x128xf32>
    %24 = vector.broadcast %23 : vector<1x128xf32> to vector<16x128xf32>
    %25 = arith.addf %21, %24 : vector<16x128xf32>
    %26 = arith.truncf %25 : vector<16x128xf32> to vector<16x128xbf16>
    %c0_9 = arith.constant 0 : index
    %c0_10 = arith.constant 0 : index
    %27 = vector.load %arg4[%c0_9, %c0_10] : memref<16x128xbf16, #tpu.memory_space<vmem>>, vector<16x128xbf16>
    tpu.vector_store %arg4[%c0_9, %c0_10], %26 {strides = array<i32>} : memref<16x128xbf16, #tpu.memory_space<vmem>>, vector<16x128xbf16>,
    return
  }
  func.func @transform_0(%arg0: i32) -> (i32, i32) {
    %c0_i32 = arith.constant 0 : i32
    %c0_i32_0 = arith.constant 0 : i32
    return %arg0, %c0_i32 : i32, i32
  }
  func.func @transform_1(%arg0: i32) -> (i32, i32) {
    %c0_i32 = arith.constant 0 : i32
    %c0_i32_0 = arith.constant 0 : i32
    %c0_i32_1 = arith.constant 0 : i32
    return %c0_i32, %c0_i32_0 : i32, i32
  }
  func.func @transform_2(%arg0: i32) -> (i32, i32) {
    %c0_i32 = arith.constant 0 : i32
    %c0_i32_0 = arith.constant 0 : i32
    %c0_i32_1 = arith.constant 0 : i32
    return %c0_i32, %c0_i32_0 : i32, i32
  }
  func.func @transform_3(%arg0: i32) -> (i32, i32) {
    %c0_i32 = arith.constant 0 : i32
    %c0_i32_0 = arith.constant 0 : i32
    return %arg0, %c0_i32 : i32, i32
  }
}

</mosaic_0001>

<bundles_post_ra>
// kernel: tpu_custom_call.1
= control target key start
LH: loop header
LB: loop body
LE: loop exit
PB: predicated region body
PF: predicated region fallthrough
CT: control target
= control target key end

     0   :  { %8 = vsyncpa [#allocation3], 0  ;;  %s228_s0 = inlined_call_operand.hbm [shape: bf16[16,128], index: 0, kind: input, shape index: {}]   ;;  %s229_s1 = inlined_call_operand.vmem [shape: bf16[1,128], index: 1, kind: input, shape index: {}]   ;;  %s230_s2 = inlined_call_operand.vmem [shape: bf16[1,128], index: 2, kind: input, shape index: {}]   ;;  %s231_s3 = inlined_call_operand.hbm [shape: bf16[16,128], index: 3, kind: output, shape index: {}]  }
   0x1   :  { %9 = vsyncpa [#allocation4], 0  ;;  %s168_s12 = smov [#allocation2]   ;;  %s120_s16 = scalar_lea.hbm %s228_s0, 128 }
   0x2   :  { %s15_s13 = sshll.u32 %s168_s12, 4  ;;  %p121_p0 = scmp.ne.s32.totalorder %s228_s0, %s120_s16  ;;  %s16_s13 = int_to_ptr.vmem [resolvable:$true] %s15_s13 }
   0x3   :  { %p124_p1 = scmp.lt.u32.totalorder %s120_s16, %s228_s0 }
   0x5   :  { %p126_p2 = pnand %p124_p1, %p121_p0 }
   0x7   :  { %129 = shalt.err (!%p126_p2)
}
   0x8   :  { %s130_s21 = scalar_lea.vmem %s16_s13, 128  ;;  %p135_p4 = scmp.lt.s32.totalorder %s16_s13, %s16_s13 }
   0x9   :  { %p131_p3 = scmp.ne.s32.totalorder %s16_s13, %s130_s21  ;;  %p136_p5 = scmp.lt.s32.totalorder %s130_s21, %s130_s21 }
   0xb   :  { %p137_p6 = por %p136_p5, %p135_p4 }
   0xd   :  { %p138_p7 = pnand %p137_p6, %p131_p3 }
   0xf   :  { %141 = shalt.err (!%p138_p7)
}
  0x10   :  { %s169_s22 = smov 64   ;;  %s170_s23 = smov 4  }
  0x11   :  { %21 = dma.hbm_to_vmem [thread:$0]  %s228_s0, 128, %s16_s13, [#allocation3], %s169_s22, %s169_s22, %s170_s23  }
  0x12   :  { %164 = dma.done.wait [#allocation3], 128  }
  0x13   :  { %165 = vsyncadd [#allocation3], 4294967168  ;;  %v104_v0 = vld [vmem:[#allocation2] sm:$0xff]   ;;  %v58_v15 = vlaneseq  ;;  %s171_s29 = smov [#allocation5]  }
  0x14   :  { %v105_v1 = vunpack.c.l.bf16 %v104_v0  ;;  %v106_v2 = vunpack.c.h.bf16 %v104_v0  ;;  %v56_v19 = vld [vmem:[%s229_s1] sm:$0x1]  ;;  %s87_s30 = sshll.u32 %s171_s29, 4  ;;  %s88_s30 = int_to_ptr.vmem [resolvable:$true] %s87_s30 }
  0x15   :  { %v59_v18 = vshrl.u32 %v58_v15, 7  ;;  %v57_v20 = vunpack.c.l.bf16 %v56_v19  ;;  %v64_v22 = vld [vmem:[%s230_s2] sm:$0x1]  ;;  %s142_s1 = scalar_lea.vmem %s88_s30, 128  ;;  %p147_p9 = scmp.lt.s32.totalorder %s88_s30, %s88_s30 }
  0x16   :  { %33 = vadd.xlane.f32.xlu0 %v105_v1  ;;  %v65_v26 = vunpack.c.l.bf16 %v64_v22  ;;  %p143_p8 = scmp.ne.s32.totalorder %s88_s30, %s142_s1  ;;  %p148_p10 = scmp.lt.s32.totalorder %s142_s1, %s142_s1 }
  0x17   :  { %v60_v21 = vsub.s32 0, %v59_v18 }
  0x18   :  { %p149_p11 = por %p148_p10, %p147_p9 }
  0x19   :  { %v61_v25 = vrot.slane %v57_v20, %v60_v21  ;;  %v69_v30 = vrot.slane %v65_v26, %v60_v21 }
  0x1a   :  { %35 = vadd.xlane.f32.xlu0 %v106_v2  ;;  %p150_p12 = pnand %p149_p11, %p143_p8 }
  0xa3   :  { %v34_v3 = vpop.xlane.xlu0 %33 }
  0xa4   :  { %v38_v4 = vmul.f32 0.0078125, %v34_v3 }
  0xa6   :  { %v40_v5 = vsub.f32 %v105_v1, %v38_v4 }
  0xa7   :  { %v36_v6 = vpop.xlane.xlu0 %35 }
  0xa8   :  { %v39_v7 = vmul.f32 0.0078125, %v36_v6  ;;  %v42_v8 = vmul.f32 %v40_v5, %v40_v5 }
  0xaa   :  { %v41_v9 = vsub.f32 %v106_v2, %v39_v7  ;;  %44 = vadd.xlane.f32.xlu1 %v42_v8 }
  0xac   :  { %v43_v10 = vmul.f32 %v41_v9, %v41_v9 }
  0xae   :  { %46 = vadd.xlane.f32.xlu1 %v43_v10 }
 0x137   :  { %v45_v11 = vpop.xlane.xlu1 %44 }
 0x138   :  { %v48_v12 = vmul.f32 0.0078125, %v45_v11 }
 0x13a   :  { %v50_v13 = vadd.f32 1e-12, %v48_v12 }
 0x13b   :  { %v47_v14 = vpop.xlane.xlu1 %46 }
 0x13c   :  { %116 = vrsqrt.f32 %v50_v13  ;;  %v49_v16 = vmul.f32 0.0078125, %v47_v14 }
 0x13e   :  { %v51_v17 = vadd.f32 1e-12, %v49_v16 }
 0x140   :  { %118 = vrsqrt.f32 %v51_v17 }
 0x146   :  { %v117_v23 = vpop.eup %116 }
 0x147   :  { %v54_v24 = vmul.f32 %v117_v23, %v40_v5 }
 0x149   :  { %v62_v29 = vmul.f32 %v61_v25, %v54_v24 }
 0x14a   :  { %v119_v27 = vpop.eup %118 }
 0x14b   :  { %v55_v28 = vmul.f32 %v119_v27, %v41_v9  ;;  %v70_v32 = vadd.f32 %v69_v30, %v62_v29 }
 0x14d   :  { %v63_v31 = vmul.f32 %v61_v25, %v55_v28 }
 0x14f   :  { %v71_v33 = vadd.f32 %v69_v30, %v63_v31 }
 0x151   :  { %v110_v34 = vpack.c.bf16 %v71_v33, %v70_v32 }
 0x153   :  { %111 = vst [vmem:[#allocation5] sm:$0xff] %v110_v34  }
 0x154   :  { %153 = shalt.err (!%p150_p12)
}
 0x155   :  { %s154_s5 = scalar_lea.hbm %s231_s3, 128 }
 0x156   :  { %p155_p13 = scmp.ne.s32.totalorder %s231_s3, %s154_s5  ;;  %p158_p0 = scmp.lt.u32.totalorder %s154_s5, %s231_s3 }
 0x158   :  { %p160_p1 = pnand %p158_p0, %p155_p13 }
 0x15a   :  { %163 = shalt.err (!%p160_p1)
}
 0x15b   :  { %93 = dma.vmem_to_hbm [thread:$0]  %s88_s30, 128, %s231_s3, [#allocation4], %s169_s22, %s169_s22, %s170_s23  }
 0x15c   :  { %166 = dma.done.wait [#allocation4], 128  }
 0x15d   :  { %167 = vsyncadd [#allocation4], 4294967168 }
 0x15e   :  { %97 = vsyncpa [#allocation3], 1 }
 0x15f   :  { %98 = vsyncpa [#allocation4], 1 }

</bundles_post_ra>
